<compile_context>
chip_gen: v7x
topology: tpu7x:2x2x1
jax: 0.10.0
libtpu: 0.0.40
codegen_flags: <defaults>
</compile_context>

<pallas_src>
import functools
import math

import jax
import jax.numpy as jnp
from jax.experimental import pallas as pl
from jax.experimental.pallas import tpu as pltpu


# ----------------------------------------------------------------------------
# Fused kernel: QKV projection + per-head attention + output projection.
# ----------------------------------------------------------------------------
def _mhsa_kernel(x_ref, wqkv_ref, bqkv_ref, wo_ref, bo_ref, o_ref,
                 *, n_heads, dph, scale):
    x = x_ref[0]                                              # (S, x_dim)
    hidden = n_heads * dph

    # One lane-dense matmul for all heads' Q, K, V.
    qkv = jnp.dot(x, wqkv_ref[...],
                  preferred_element_type=jnp.float32) + bqkv_ref[...]
    q = qkv[:, 0 * hidden:1 * hidden] * scale                 # (S, hidden)
    k = qkv[:, 1 * hidden:2 * hidden]
    v = qkv[:, 2 * hidden:3 * hidden]

    # Per-head scaled dot-product attention (unrolled; static lane slices).
    # TODO(synk): for large S, replace with flash-style online-softmax tiling
    # over a KV grid axis so the (S, S) scores never fully materialize.
    head_outs = []
    for h in range(n_heads):
        lo, hi = h * dph, (h + 1) * dph
        qh, kh, vh = q[:, lo:hi], k[:, lo:hi], v[:, lo:hi]    # (S, dph)

        s = jnp.dot(qh, kh.T, preferred_element_type=jnp.float32)
        s = s - jnp.max(s, axis=-1, keepdims=True)
        p = jnp.exp(s)
        inv_l = pl.reciprocal(jnp.sum(p, axis=-1, keepdims=True), approx=True)
        oh = jnp.dot(p, vh, preferred_element_type=jnp.float32) * inv_l
        head_outs.append(oh)                                  # (S, dph)

    concat = jnp.concatenate(head_outs, axis=-1)              # (S, hidden)

    # Fused output projection (W_O resident in VMEM across the batch grid).
    y = jnp.dot(concat, wo_ref[...],
                preferred_element_type=jnp.float32) + bo_ref[...]
    o_ref[...] = y[None].astype(o_ref.dtype)


def multi_head_self_attention(x, params, n_heads):
    """x: (B, S, x_dim).  params: packed weights (see __main__)."""
    B, S, x_dim = x.shape
    w_qkv = params["w_qkv"]            # (x_dim, 3*hidden)
    b_qkv = params["b_qkv"]            # (1, 3*hidden)
    wo = params["wo"]                  # (hidden, hidden)
    bo = params["bo"]                  # (1, hidden)
    hidden = wo.shape[0]
    dph = hidden // n_heads
    scale = 1.0 / math.sqrt(dph)       # torch: softmax(sim / sqrt(dim_per_head))

    kernel = functools.partial(_mhsa_kernel,
                               n_heads=n_heads, dph=dph, scale=scale)
    return pl.pallas_call(
        kernel,
        out_shape=jax.ShapeDtypeStruct((B, S, hidden), x.dtype),
        grid=(B,),
        in_specs=[
            pl.BlockSpec((1, S, x_dim), lambda b: (b, 0, 0)),        # x
            pl.BlockSpec((x_dim, 3 * hidden), lambda b: (0, 0)),     # w_qkv
            pl.BlockSpec((1, 3 * hidden), lambda b: (0, 0)),         # b_qkv
            pl.BlockSpec((hidden, hidden), lambda b: (0, 0)),        # wo
            pl.BlockSpec((1, hidden), lambda b: (0, 0)),             # bo
        ],
        out_specs=pl.BlockSpec((1, S, hidden), lambda b: (b, 0, 0)),
        compiler_params=pltpu.CompilerParams(
            dimension_semantics=("parallel",)),
    )(x, w_qkv, b_qkv, wo, bo)


# ----------------------------------------------------------------------------
# Pure-JAX reference (mirrors the PyTorch forward exactly, per-head weights).
# ----------------------------------------------------------------------------
def reference(x, per_head, n_heads):
    wq, bq, wk, bk, wv, bv, wo, bo = (per_head[k] for k in
                                      ("wq", "bq", "wk", "bk", "wv", "bv",
                                       "wo", "bo"))
    dph = wq.shape[-1]
    outs = []
    for h in range(n_heads):
        q = x @ wq[h] + bq[h]
        k = x @ wk[h] + bk[h]
        v = x @ wv[h] + bv[h]
        s = jnp.einsum("bqd,bkd->bqk", q, k) / math.sqrt(dph)
        p = jax.nn.softmax(s, axis=-1)
        outs.append(jnp.einsum("bqk,bkd->bqd", p, v))
    concat = jnp.concatenate(outs, axis=-1)
    return concat @ wo + bo[0]


if __name__ == "__main__":
    B, S, x_dim, hidden_dim, n_heads = 2, 8, 16, 32, 4
    dph = hidden_dim // n_heads

    key = jax.random.PRNGKey(0)
    keys = jax.random.split(key, 9)
    per_head = {
        "wq": jax.random.normal(keys[0], (n_heads, x_dim, dph), jnp.float32) * 0.1,
        "bq": jax.random.normal(keys[1], (n_heads, dph), jnp.float32) * 0.1,
        "wk": jax.random.normal(keys[2], (n_heads, x_dim, dph), jnp.float32) * 0.1,
        "bk": jax.random.normal(keys[3], (n_heads, dph), jnp.float32) * 0.1,
        "wv": jax.random.normal(keys[4], (n_heads, x_dim, dph), jnp.float32) * 0.1,
        "bv": jax.random.normal(keys[5], (n_heads, dph), jnp.float32) * 0.1,
        "wo": jax.random.normal(keys[6], (hidden_dim, hidden_dim), jnp.float32) * 0.1,
        "bo": jax.random.normal(keys[7], (1, hidden_dim), jnp.float32) * 0.1,
    }
    x = jax.random.normal(keys[8], (B, S, x_dim), jnp.float32)

    # Pack per-head weights into one lane-dense QKV weight / bias (done once,
    # at parameter-construction time, not per call).
    def _pack_w(w):   # (H, x_dim, dph) -> (x_dim, H*dph), head-major columns
        return jnp.transpose(w, (1, 0, 2)).reshape(x_dim, n_heads * dph)

    def _pack_b(b):   # (H, dph) -> (H*dph,)
        return b.reshape(n_heads * dph)

    params = {
        "w_qkv": jnp.concatenate(
            [_pack_w(per_head["wq"]), _pack_w(per_head["wk"]),
             _pack_w(per_head["wv"])], axis=-1),               # (x_dim, 3*hidden)
        "b_qkv": jnp.concatenate(
            [_pack_b(per_head["bq"]), _pack_b(per_head["bk"]),
             _pack_b(per_head["bv"])], axis=-1)[None, :],      # (1, 3*hidden)
        "wo": per_head["wo"],
        "bo": per_head["bo"],
    }

    out = multi_head_self_attention(x, params, n_heads)
    out = jax.block_until_ready(out)

    ref = reference(x, per_head, n_heads)
    assert out.shape == (B, S, hidden_dim)
    # Slightly relaxed tolerance: approx reciprocal (EUP vrcp) in the softmax.
    assert jnp.allclose(out, ref, atol=2e-3, rtol=2e-3), "mismatch vs reference"
    print("KERNEL_OK")
</pallas_src>

<mosaic_0001>
module attributes {stable_mosaic.version = 11 : i64} {
  func.func @_mhsa_kernel(%arg0: i32, %arg1: memref<1x8x16xf32, #tpu.memory_space<vmem>>, %arg2: memref<16x96xf32, #tpu.memory_space<vmem>>, %arg3: memref<1x96xf32, #tpu.memory_space<vmem>>, %arg4: memref<32x32xf32, #tpu.memory_space<vmem>>, %arg5: memref<1x32xf32, #tpu.memory_space<vmem>>, %arg6: memref<1x8x32xf32, #tpu.memory_space<vmem>>) attributes {dimension_semantics = [#tpu.dimension_semantics<parallel>], iteration_bounds = array<i64: 2>, scalar_prefetch = 0 : i64, scratch_operands = 0 : i64, tpu.core_type = #tpu.core_type<tc>, window_params = [{transform_indices = @transform_0, window_bounds = array<i64: 1, 8, 16>}, {pipeline_mode = #tpu.pipeline_mode<synchronous>, transform_indices = @transform_1, window_bounds = array<i64: 16, 96>}, {pipeline_mode = #tpu.pipeline_mode<synchronous>, transform_indices = @transform_2, window_bounds = array<i64: 1, 96>}, {pipeline_mode = #tpu.pipeline_mode<synchronous>, transform_indices = @transform_3, window_bounds = array<i64: 32, 32>}, {pipeline_mode = #tpu.pipeline_mode<synchronous>, transform_indices = @transform_4, window_bounds = array<i64: 1, 32>}, {transform_indices = @transform_5, window_bounds = array<i64: 1, 8, 32>}]} {
    %c0 = arith.constant 0 : index
    %c0_0 = arith.constant 0 : index
    %c0_1 = arith.constant 0 : index
    %0 = vector.load %arg1[%c0, %c0_0, %c0_1] : memref<1x8x16xf32, #tpu.memory_space<vmem>>, vector<1x8x16xf32>
    %1 = vector.shape_cast %0 : vector<1x8x16xf32> to vector<8x16xf32>
    %c0_2 = arith.constant 0 : index
    %c0_3 = arith.constant 0 : index
    %2 = vector.load %arg2[%c0_2, %c0_3] : memref<16x96xf32, #tpu.memory_space<vmem>>, vector<16x96xf32>
    %cst = arith.constant dense<0.000000e+00> : vector<8x96xf32>
    %3 = tpu.matmul %1, %2, %cst {dimension_numbers = #tpu.dot_dimension_numbers<[1], [0], [0], [1], [0, 0, 1, 1], [], []>} : vector<8x16xf32>, vector<16x96xf32>, vector<8x96xf32> -> vector<8x96xf32>
    %c0_4 = arith.constant 0 : index
    %c0_5 = arith.constant 0 : index
    %4 = vector.load %arg3[%c0_4, %c0_5] : memref<1x96xf32, #tpu.memory_space<vmem>>, vector<1x96xf32>
    %5 = vector.broadcast %4 : vector<1x96xf32> to vector<8x96xf32>
    %6 = arith.addf %3, %5 : vector<8x96xf32>
    %7 = vector.extract_strided_slice %6 {offsets = [0, 0], sizes = [8, 32], strides = [1, 1]} : vector<8x96xf32> to vector<8x32xf32>
    %cst_6 = arith.constant 0.353553385 : f32
    %8 = vector.broadcast %cst_6 : f32 to vector<8x32xf32>
    %9 = arith.mulf %7, %8 : vector<8x32xf32>
    %10 = vector.extract_strided_slice %6 {offsets = [0, 32], sizes = [8, 32], strides = [1, 1]} : vector<8x96xf32> to vector<8x32xf32>
    %11 = vector.extract_strided_slice %6 {offsets = [0, 64], sizes = [8, 32], strides = [1, 1]} : vector<8x96xf32> to vector<8x32xf32>
    %12 = vector.extract_strided_slice %9 {offsets = [0, 0], sizes = [8, 8], strides = [1, 1]} : vector<8x32xf32> to vector<8x8xf32>
    %13 = vector.extract_strided_slice %10 {offsets = [0, 0], sizes = [8, 8], strides = [1, 1]} : vector<8x32xf32> to vector<8x8xf32>
    %14 = vector.extract_strided_slice %11 {offsets = [0, 0], sizes = [8, 8], strides = [1, 1]} : vector<8x32xf32> to vector<8x8xf32>
    %15 = tpu.transpose %13, [1, 0] : vector<8x8xf32> -> vector<8x8xf32>
    %cst_7 = arith.constant dense<0.000000e+00> : vector<8x8xf32>
    %16 = tpu.matmul %12, %15, %cst_7 {dimension_numbers = #tpu.dot_dimension_numbers<[1], [0], [0], [1], [0, 0, 1, 1], [], []>} : vector<8x8xf32>, vector<8x8xf32>, vector<8x8xf32> -> vector<8x8xf32>
    %cst_8 = arith.constant dense<0xFF800000> : vector<8xf32>
    %17 = vector.multi_reduction <maximumf>, %16, %cst_8 [1] : vector<8x8xf32> to vector<8xf32>
    %18 = vector.shape_cast %17 : vector<8xf32> to vector<8x1xf32>
    %19 = vector.broadcast %18 : vector<8x1xf32> to vector<8x8xf32>
    %20 = arith.subf %16, %19 : vector<8x8xf32>
    %21 = math.exp %20 : vector<8x8xf32>
    %cst_9 = arith.constant dense<0.000000e+00> : vector<8xf32>
    %22 = vector.multi_reduction <add>, %21, %cst_9 [1] : vector<8x8xf32> to vector<8xf32>
    %23 = vector.shape_cast %22 : vector<8xf32> to vector<8x1xf32>
    %24 = tpu.reciprocal %23 {approx = true} : vector<8x1xf32> -> vector<8x1xf32>
    %cst_10 = arith.constant dense<0.000000e+00> : vector<8x8xf32>
    %25 = tpu.matmul %21, %14, %cst_10 {dimension_numbers = #tpu.dot_dimension_numbers<[1], [0], [0], [1], [0, 0, 1, 1], [], []>} : vector<8x8xf32>, vector<8x8xf32>, vector<8x8xf32> -> vector<8x8xf32>
    %26 = vector.broadcast %24 : vector<8x1xf32> to vector<8x8xf32>
    %27 = arith.mulf %25, %26 : vector<8x8xf32>
    %28 = vector.extract_strided_slice %9 {offsets = [0, 8], sizes = [8, 8], strides = [1, 1]} : vector<8x32xf32> to vector<8x8xf32>
    %29 = vector.extract_strided_slice %10 {offsets = [0, 8], sizes = [8, 8], strides = [1, 1]} : vector<8x32xf32> to vector<8x8xf32>
    %30 = vector.extract_strided_slice %11 {offsets = [0, 8], sizes = [8, 8], strides = [1, 1]} : vector<8x32xf32> to vector<8x8xf32>
    %31 = tpu.transpose %29, [1, 0] : vector<8x8xf32> -> vector<8x8xf32>
    %cst_11 = arith.constant dense<0.000000e+00> : vector<8x8xf32>
    %32 = tpu.matmul %28, %31, %cst_11 {dimension_numbers = #tpu.dot_dimension_numbers<[1], [0], [0], [1], [0, 0, 1, 1], [], []>} : vector<8x8xf32>, vector<8x8xf32>, vector<8x8xf32> -> vector<8x8xf32>
    %cst_12 = arith.constant dense<0xFF800000> : vector<8xf32>
    %33 = vector.multi_reduction <maximumf>, %32, %cst_12 [1] : vector<8x8xf32> to vector<8xf32>
    %34 = vector.shape_cast %33 : vector<8xf32> to vector<8x1xf32>
    %35 = vector.broadcast %34 : vector<8x1xf32> to vector<8x8xf32>
    %36 = arith.subf %32, %35 : vector<8x8xf32>
    %37 = math.exp %36 : vector<8x8xf32>
    %cst_13 = arith.constant dense<0.000000e+00> : vector<8xf32>
    %38 = vector.multi_reduction <add>, %37, %cst_13 [1] : vector<8x8xf32> to vector<8xf32>
    %39 = vector.shape_cast %38 : vector<8xf32> to vector<8x1xf32>
    %40 = tpu.reciprocal %39 {approx = true} : vector<8x1xf32> -> vector<8x1xf32>
    %cst_14 = arith.constant dense<0.000000e+00> : vector<8x8xf32>
    %41 = tpu.matmul %37, %30, %cst_14 {dimension_numbers = #tpu.dot_dimension_numbers<[1], [0], [0], [1], [0, 0, 1, 1], [], []>} : vector<8x8xf32>, vector<8x8xf32>, vector<8x8xf32> -> vector<8x8xf32>
    %42 = vector.broadcast %40 : vector<8x1xf32> to vector<8x8xf32>
    %43 = arith.mulf %41, %42 : vector<8x8xf32>
    %44 = vector.extract_strided_slice %9 {offsets = [0, 16], sizes = [8, 8], strides = [1, 1]} : vector<8x32xf32> to vector<8x8xf32>
    %45 = vector.extract_strided_slice %10 {offsets = [0, 16], sizes = [8, 8], strides = [1, 1]} : vector<8x32xf32> to vector<8x8xf32>
    %46 = vector.extract_strided_slice %11 {offsets = [0, 16], sizes = [8, 8], strides = [1, 1]} : vector<8x32xf32> to vector<8x8xf32>
    %47 = tpu.transpose %45, [1, 0] : vector<8x8xf32> -> vector<8x8xf32>
    %cst_15 = arith.constant dense<0.000000e+00> : vector<8x8xf32>
    %48 = tpu.matmul %44, %47, %cst_15 {dimension_numbers = #tpu.dot_dimension_numbers<[1], [0], [0], [1], [0, 0, 1, 1], [], []>} : vector<8x8xf32>, vector<8x8xf32>, vector<8x8xf32> -> vector<8x8xf32>
    %cst_16 = arith.constant dense<0xFF800000> : vector<8xf32>
    %49 = vector.multi_reduction <maximumf>, %48, %cst_16 [1] : vector<8x8xf32> to vector<8xf32>
    %50 = vector.shape_cast %49 : vector<8xf32> to vector<8x1xf32>
    %51 = vector.broadcast %50 : vector<8x1xf32> to vector<8x8xf32>
    %52 = arith.subf %48, %51 : vector<8x8xf32>
    %53 = math.exp %52 : vector<8x8xf32>
    %cst_17 = arith.constant dense<0.000000e+00> : vector<8xf32>
    %54 = vector.multi_reduction <add>, %53, %cst_17 [1] : vector<8x8xf32> to vector<8xf32>
    %55 = vector.shape_cast %54 : vector<8xf32> to vector<8x1xf32>
    %56 = tpu.reciprocal %55 {approx = true} : vector<8x1xf32> -> vector<8x1xf32>
    %cst_18 = arith.constant dense<0.000000e+00> : vector<8x8xf32>
    %57 = tpu.matmul %53, %46, %cst_18 {dimension_numbers = #tpu.dot_dimension_numbers<[1], [0], [0], [1], [0, 0, 1, 1], [], []>} : vector<8x8xf32>, vector<8x8xf32>, vector<8x8xf32> -> vector<8x8xf32>
    %58 = vector.broadcast %56 : vector<8x1xf32> to vector<8x8xf32>
    %59 = arith.mulf %57, %58 : vector<8x8xf32>
    %60 = vector.extract_strided_slice %9 {offsets = [0, 24], sizes = [8, 8], strides = [1, 1]} : vector<8x32xf32> to vector<8x8xf32>
    %61 = vector.extract_strided_slice %10 {offsets = [0, 24], sizes = [8, 8], strides = [1, 1]} : vector<8x32xf32> to vector<8x8xf32>
    %62 = vector.extract_strided_slice %11 {offsets = [0, 24], sizes = [8, 8], strides = [1, 1]} : vector<8x32xf32> to vector<8x8xf32>
    %63 = tpu.transpose %61, [1, 0] : vector<8x8xf32> -> vector<8x8xf32>
    %cst_19 = arith.constant dense<0.000000e+00> : vector<8x8xf32>
    %64 = tpu.matmul %60, %63, %cst_19 {dimension_numbers = #tpu.dot_dimension_numbers<[1], [0], [0], [1], [0, 0, 1, 1], [], []>} : vector<8x8xf32>, vector<8x8xf32>, vector<8x8xf32> -> vector<8x8xf32>
    %cst_20 = arith.constant dense<0xFF800000> : vector<8xf32>
    %65 = vector.multi_reduction <maximumf>, %64, %cst_20 [1] : vector<8x8xf32> to vector<8xf32>
    %66 = vector.shape_cast %65 : vector<8xf32> to vector<8x1xf32>
    %67 = vector.broadcast %66 : vector<8x1xf32> to vector<8x8xf32>
    %68 = arith.subf %64, %67 : vector<8x8xf32>
    %69 = math.exp %68 : vector<8x8xf32>
    %cst_21 = arith.constant dense<0.000000e+00> : vector<8xf32>
    %70 = vector.multi_reduction <add>, %69, %cst_21 [1] : vector<8x8xf32> to vector<8xf32>
    %71 = vector.shape_cast %70 : vector<8xf32> to vector<8x1xf32>
    %72 = tpu.reciprocal %71 {approx = true} : vector<8x1xf32> -> vector<8x1xf32>
    %cst_22 = arith.constant dense<0.000000e+00> : vector<8x8xf32>
    %73 = tpu.matmul %69, %62, %cst_22 {dimension_numbers = #tpu.dot_dimension_numbers<[1], [0], [0], [1], [0, 0, 1, 1], [], []>} : vector<8x8xf32>, vector<8x8xf32>, vector<8x8xf32> -> vector<8x8xf32>
    %74 = vector.broadcast %72 : vector<8x1xf32> to vector<8x8xf32>
    %75 = arith.mulf %73, %74 : vector<8x8xf32>
    %76 = tpu.concatenate %27, %43, %59, %75 in 1 : vector<8x8xf32>, vector<8x8xf32>, vector<8x8xf32>, vector<8x8xf32> -> vector<8x32xf32>
    %c0_23 = arith.constant 0 : index
    %c0_24 = arith.constant 0 : index
    %77 = vector.load %arg4[%c0_23, %c0_24] : memref<32x32xf32, #tpu.memory_space<vmem>>, vector<32x32xf32>
    %cst_25 = arith.constant dense<0.000000e+00> : vector<8x32xf32>
    %78 = tpu.matmul %76, %77, %cst_25 {dimension_numbers = #tpu.dot_dimension_numbers<[1], [0], [0], [1], [0, 0, 1, 1], [], []>} : vector<8x32xf32>, vector<32x32xf32>, vector<8x32xf32> -> vector<8x32xf32>
    %c0_26 = arith.constant 0 : index
    %c0_27 = arith.constant 0 : index
    %79 = vector.load %arg5[%c0_26, %c0_27] : memref<1x32xf32, #tpu.memory_space<vmem>>, vector<1x32xf32>
    %80 = vector.broadcast %79 : vector<1x32xf32> to vector<8x32xf32>
    %81 = arith.addf %78, %80 : vector<8x32xf32>
    %82 = vector.shape_cast %81 : vector<8x32xf32> to vector<1x8x32xf32>
    %c0_28 = arith.constant 0 : index
    %c0_29 = arith.constant 0 : index
    %c0_30 = arith.constant 0 : index
    %83 = vector.load %arg6[%c0_28, %c0_29, %c0_30] : memref<1x8x32xf32, #tpu.memory_space<vmem>>, vector<1x8x32xf32>
    tpu.vector_store %arg6[%c0_28, %c0_29, %c0_30], %82 {strides = array<i32>} : memref<1x8x32xf32, #tpu.memory_space<vmem>>, vector<1x8x32xf32>,
    return
  }
  func.func @transform_0(%arg0: i32) -> (i32, i32, i32) {
    %c0_i32 = arith.constant 0 : i32
    %c0_i32_0 = arith.constant 0 : i32
    %c0_i32_1 = arith.constant 0 : i32
    return %arg0, %c0_i32, %c0_i32_0 : i32, i32, i32
  }
  func.func @transform_1(%arg0: i32) -> (i32, i32) {
    %c0_i32 = arith.constant 0 : i32
    %c0_i32_0 = arith.constant 0 : i32
    %c0_i32_1 = arith.constant 0 : i32
    return %c0_i32, %c0_i32_0 : i32, i32
  }
  func.func @transform_2(%arg0: i32) -> (i32, i32) {
    %c0_i32 = arith.constant 0 : i32
    %c0_i32_0 = arith.constant 0 : i32
    %c0_i32_1 = arith.constant 0 : i32
    return %c0_i32, %c0_i32_0 : i32, i32
  }
  func.func @transform_3(%arg0: i32) -> (i32, i32) {
    %c0_i32 = arith.constant 0 : i32
    %c0_i32_0 = arith.constant 0 : i32
    %c0_i32_1 = arith.constant 0 : i32
    return %c0_i32, %c0_i32_0 : i32, i32
  }
  func.func @transform_4(%arg0: i32) -> (i32, i32) {
    %c0_i32 = arith.constant 0 : i32
    %c0_i32_0 = arith.constant 0 : i32
    %c0_i32_1 = arith.constant 0 : i32
    return %c0_i32, %c0_i32_0 : i32, i32
  }
  func.func @transform_5(%arg0: i32) -> (i32, i32, i32) {
    %c0_i32 = arith.constant 0 : i32
    %c0_i32_0 = arith.constant 0 : i32
    %c0_i32_1 = arith.constant 0 : i32
    return %arg0, %c0_i32, %c0_i32_0 : i32, i32, i32
  }
}

</mosaic_0001>

<bundles_post_ra>
// kernel: tpu_custom_call.1
= control target key start
LH: loop header
LB: loop body
LE: loop exit
PB: predicated region body
PF: predicated region fallthrough
CT: control target
= control target key end

     0   :  { %10 = vsyncpa [#allocation3], 0  ;;  %s1960_s0 = inlined_call_operand.hbm [shape: f32[2,8,16], index: 0, kind: input, shape index: {}]   ;;  %s1961_s1 = inlined_call_operand.hbm [shape: f32[16,96], index: 1, kind: input, shape index: {}]   ;;  %s1962_s2 = inlined_call_operand.vmem [shape: f32[1,96], index: 2, kind: input, shape index: {}]   ;;  %s1963_s3 = inlined_call_operand.hbm [shape: f32[32,32], index: 3, kind: input, shape index: {}]   ;;  %s1964_s4 = inlined_call_operand.vmem [shape: f32[1,32], index: 4, kind: input, shape index: {}]   ;;  %s1965_s5 = inlined_call_operand.hbm [shape: f32[2,8,32], index: 5, kind: output, shape index: {}]  }
   0x1   :  { %12 = vsyncpa [#allocation3 + $0x1], 0 }
   0x2   :  { %13 = vsyncpa [#allocation6], 0 }
   0x3   :  { %14 = vsyncpa [#allocation4], 0 }
   0x4   :  { %16 = vsyncpa [#allocation4 + $0x1], 0  ;;  %s1656_s18 = smov 0   ;;  %s1658_s19 = smov 0  }
   0x5   :  { %s1660_s20 = smov 0   ;;  %s1662_s21 = smov 0  }
   0x6 LB: > { %s1677_s22 = sadd.s32 4294967295, %s1601_s21   ;;  %s1220_s23 = sadd.s32 4294967294, %s1601_s21   ;;  %s1601_s21 = sphi %s1662_s21, %s1985_s21   ;;  %s1597_s20 = sphi %s1660_s20, %s1984_s20   ;;  %s1593_s19 = sphi %s1658_s19, %s1983_s19   ;;  %s1589_s18 = sphi %s1656_s18, %s1982_s18  }
   0x7   : > { %p42_p0 = scmp.ne.s32.totalorder %s1593_s19, %s1589_s18  ;;  %p1966_p1 = scmp.eq.s32.totalorder %s1677_s22, 0 }
   0x8   : > { %p156_p3 = scmp.eq.s32.totalorder %s1220_s23, 1  ;;  %p1221_p5 = scmp.ge.s32.totalorder %s1601_s21, 1 }
   0x9   : > { %p1686_p4 = por %p1966_p1, %p42_p0  ;;  %p163_p7 = scmp.lt.s32.totalorder %s1601_s21, 3 }
   0xa   : > { %p1691_p6 = por %p156_p3, %p42_p0  ;;  %s1603_s27 = smov [#allocation5]  }
   0xb   : > { %s1969_s24 = scalar_select %p1686_p4, 1, 0 }
   0xc   : > { %s1970_s25 = scalar_select %p1691_p6, 1, 0 }
   0xd   : > { %p1696_p8 = pnand %p1221_p5, %p163_p7  ;;  %s175_s28 = sshll.u32 %s1603_s27, 4  ;;  %s1700_s28 = int_to_ptr.vmem [resolvable:$true] %s175_s28 }
   0xe   : > { %s1604_s30 = smov [#allocation7]   ;;  %s1445_s9 = scalar_lea.hbm %s1961_s1, 256 }
   0xf   : > { %p1355_p9 = pneg %p1696_p8  ;;  %s191_s6 = sshll.u32 %s1604_s30, 4  ;;  %s1711_s6 = int_to_ptr.vmem [resolvable:$true] %s191_s6 }
  0x10   : > { %p1446_p12 = scmp.ne.s32.totalorder %s1961_s1, %s1445_s9  ;;  %p1452_p5 = scmp.lt.u32.totalorder %s1445_s9, %s1961_s1 }
  0x11   : > { %p1707_p11 = pnand %p1355_p9, %p1966_p1 }
  0x13   : > { %p1447_p13 = pneg %p1707_p11 }
  0x15   : > { %p1448_p0 = pnand %p1447_p13, %p1446_p12 }
  0x17   : > { %p1449_p3 = pneg %p1448_p0 }
  0x19   : > { %p1454_p7 = pnand %p1452_p5, %p1449_p3 }
  0x1b   : > { %1457 = shalt.err (!%p1454_p7)
}
  0x1c   : > { %s1458_s14 = scalar_lea.vmem %s1700_s28, 256  ;;  %p1466_p2 = scmp.lt.s32.totalorder %s1700_s28, %s1700_s28 }
  0x1d   : > { %p1459_p9 = scmp.ne.s32.totalorder %s1700_s28, %s1458_s14  ;;  %p1467_p12 = scmp.lt.s32.totalorder %s1458_s14, %s1458_s14 }
  0x1f   : > { %p1461_p10 = pnand %p1459_p9, %p1447_p13  ;;  %p1468_p0 = por %p1467_p12, %p1466_p2 }
  0x21   : > { %p1462_p1 = pneg %p1461_p10 }
  0x23   : > { %p1469_p6 = pnand %p1468_p0, %p1462_p1 }
  0x25   : > { %1472 = shalt.err (!%p1469_p6)
}
  0x26   : > { %s1605_s15 = smov 128   ;;  %s1606_s16 = smov 8  }
  0x27   : > { %1358 = dma.hbm_to_vmem [thread:$0]  (!%p1707_p11), %s1961_s1, 256, %s1700_s28, [#allocation6], %s1605_s15, %s1605_s15, %s1606_s16  }
  0x28   : > { %s1473_s7 = scalar_lea.hbm %s1963_s3, 512 }
  0x29   : > { %p1474_p2 = scmp.ne.s32.totalorder %s1963_s3, %s1473_s7  ;;  %p1480_p10 = scmp.lt.u32.totalorder %s1473_s7, %s1963_s3 }
  0x2b   : > { %p1476_p1 = pnand %p1474_p2, %p1447_p13 }
  0x2d   : > { %p1477_p6 = pneg %p1476_p1 }
  0x2f   : > { %p1482_p3 = pnand %p1480_p10, %p1477_p6 }
  0x31   : > { %1485 = shalt.err (!%p1482_p3)
}
  0x32   : > { %s1486_s28 = scalar_lea.vmem %s1711_s6, 512  ;;  %p1494_p12 = scmp.lt.s32.totalorder %s1711_s6, %s1711_s6 }
  0x33   : > { %p1487_p5 = scmp.ne.s32.totalorder %s1711_s6, %s1486_s28  ;;  %p1495_p0 = scmp.lt.s32.totalorder %s1486_s28, %s1486_s28 }
  0x35   : > { %p1489_p7 = pnand %p1487_p5, %p1447_p13  ;;  %p1496_p2 = por %p1495_p0, %p1494_p12 }
  0x37   : > { %p1490_p9 = pneg %p1489_p7 }
  0x39   : > { %p1497_p1 = pnand %p1496_p2, %p1490_p9 }
  0x3b   : > { %1500 = shalt.err (!%p1497_p1)
}
  0x3c   : > { %1361 = dma.hbm_to_vmem [thread:$0]  (!%p1707_p11), %s1963_s3, 512, %s1711_s6, [#allocation6], %s1605_s15, %s1605_s15, %s1606_s16  }
  0x3d   : > { %s1766_s14 = sadd.s32 1, %s1601_s21   ;;  %s29_s29 = sadd.s32 1, %s1597_s20 }
  0x3e   : > { %s26_s17 = ssub.s32 %s1601_s21, %s1766_s14  ;;  %p36_p13 = scmp.ne.s32.totalorder %s1597_s20, %s1593_s19 }
  0x3f   : > { %p27_p6 = scmp.eq.s32.totalorder %s26_s17, 0  ;;  %p37_p10 = scmp.eq.s32.totalorder %s1601_s21, 0 }
  0x40   : > { %p1973_p3 = scmp.eq.s32.totalorder %s1677_s22, 1  ;;  %p1372_p7 = scmp.lt.s32.totalorder %s1601_s21, 2 }
  0x41   : > { %s1782_s27 = scalar_select %p27_p6, %s1597_s20, %s29_s29  }
  0x42   : > { %p1776_p5 = por %p1973_p3, %p36_p13  ;;  %p38_p9 = por %p37_p10, %p36_p13 }
  0x43   : > { %s208_s30 = sand.u32 1, %s1597_s20   ;;  %s1226_s6 = sshll.u32 %s1601_s21, 7 }
  0x44   : > { %s1974_s23 = scalar_select %p1776_p5, 1, 0 }
  0x45   : > { %s1225_s7 = sshll.u32 %s208_s30, 3  ;;  %s1789_s8 = scalar_lea.hbm %s1960_s0, %s1226_s6 }
  0x46   : > { %s212_s9 = scalar_lea.vmem [#allocation2], %s1225_s7  ;;  %p1793_p11 = pnand %p1372_p7, %p38_p9 }
  0x47   : > { %s219_s10 = sshll.u32 %s212_s9, 4  ;;  %s209_s28 = scalar_lea.sflag [#allocation3], %s208_s30  ;;  %s1791_s10 = int_to_ptr.vmem [resolvable:$true] %s219_s10 }
  0x48   : > { %s1501_s12 = scalar_lea.hbm %s1789_s8, 128  ;;  %p1503_p0 = pneg %p1793_p11 }
  0x49   : > { %p1502_p12 = scmp.ne.s32.totalorder %s1789_s8, %s1501_s12  ;;  %s1506_s17 = scalar_lea.hbm %s1960_s0, 256 }
  0x4a   : > { %p1507_p13 = scmp.lt.u32.totalorder %s1789_s8, %s1960_s0  ;;  %p1508_p6 = scmp.lt.u32.totalorder %s1506_s17, %s1501_s12 }
  0x4b   : > { %p1504_p2 = pnand %p1503_p0, %p1502_p12  ;;  %p1510_p3 = scmp.lt.u32.totalorder %s1501_s12, %s1789_s8 }
  0x4c   : > { %p1509_p10 = por %p1508_p6, %p1507_p13 }
  0x4d   : > { %p1505_p1 = pneg %p1504_p2 }
  0x4e   : > { %p1511_p7 = por %p1510_p3, %p1509_p10 }
  0x50   : > { %p1512_p9 = pnand %p1511_p7, %p1505_p1 }
  0x52   : > { %1515 = shalt.err (!%p1512_p9)
}
  0x53   : > { %s1516_s30 = scalar_lea.vmem %s1791_s10, 128  ;;  %s1607_s15 = smov [#allocation2]  }
  0x54   : > { %p1517_p12 = scmp.ne.s32.totalorder %s1791_s10, %s1516_s30  ;;  %s1521_s16 = sshll.u32 %s1607_s15, 4  ;;  %s1522_s16 = int_to_ptr.vmem [resolvable:$false] %s1521_s16 }
  0x55   : > { %s1523_s9 = scalar_lea.vmem %s1522_s16, 256  ;;  %p1524_p4 = scmp.lt.s32.totalorder %s1791_s10, %s1522_s16 }
  0x56   : > { %p1519_p2 = pnand %p1517_p12, %p1503_p0  ;;  %p1525_p13 = scmp.lt.s32.totalorder %s1523_s9, %s1516_s30 }
  0x58   : > { %p1520_p5 = pneg %p1519_p2  ;;  %p1526_p6 = por %p1525_p13, %p1524_p4 }
  0x5a   : > { %p1527_p10 = pnand %p1526_p6, %p1520_p5 }
  0x5c   : > { %1530 = shalt.err (!%p1527_p10)
}
  0x5d   : > { %1365 = dma.hbm_to_vmem [thread:$0]  (!%p1793_p11), %s1789_s8, 128, %s1791_s10, %s209_s28  }
  0x5e   : > { %228 = sbr.rel (%p1696_p8) target bundleno = 1424 (0x590), region = 40  ;;  %s1825_s12 = sand.u32 (!%p1696_p8), 1, %s1593_s19  }
  0x5f   : > { %s1228_s13 = sshll.u32 (!%p1696_p8), %s1825_s12, 3  ;;  %s231_s29 = scalar_lea.sflag (!%p1696_p8), [#allocation3], %s1825_s12 }
  0x60   : > { %s234_s17 = scalar_lea.vmem (!%p1696_p8), [#allocation2], %s1228_s13  ;;  %p1976_p4 = scmp.ne.s32.totalorder (!%p1696_p8), %s1969_s24, 0 }
  0x65   : > { %1576 = dma.done.wait (%p1976_p4), %s231_s29, 128  }
  0x66   : > { %1578 = vsyncadd (%p1976_p4), %s231_s29, 4294967168  ;;  %p1977_p5 = scmp.eq.s32.totalorder %s1677_s22, 0 }
  0x68   : > { %1580 = dma.done.wait (%p1977_p5), [#allocation6], 768   ;;  %p1978_p8 = pmov %p1977_p5 }
  0x69   : > { %v1608_v0 = vmov 0.0|0.0   ;;  %vm1609_vm0 = vmmov 0   ;;  %v1610_v1 = vmov 0.0   ;;  %v270_v2 = vld [vmem:[#allocation5] sm:$0xff]  ;;  %v271_v3 = vld [vmem:[#allocation5 + $0x8] sm:$0xff]  ;;  %v269_v5 = vld [vmem:[%s234_s17] sm:$0xff] }
  0x6a   : > { %1582 = vsyncadd (%p1978_p8), [#allocation6], 4294966528  ;;  %1334 = vmatprep.subr.bf16.mxu0 %v1608_v0  ;;  %1280 = vmatprep.mubr.msk.f32.mxu0 %vm1609_vm0, %v1610_v1  ;;  %v1335_v4 = vpack.c.bf16 %v271_v3, %v270_v2  ;;  %vm279_vm1 = vcmask 130048   ;;  %v1232_v6 = vld [vmem:[%s1962_s2] ss:$0 sm:$0xff]  ;;  %s1611_s8 = smov 96  }
  0x6b   : > { %1283 = vmatprep.subr.mxu1 %v1610_v1  ;;  %1285 = vmatprep.mubr.msk.f32.mxu1 %vm1609_vm0, %v1610_v1  ;;  %s1612_s10 = smov 120   ;;  %s1613_s11 = smov 88   ;;  %vm357_vm2 = vcmask 64512   ;;  %v1031_v62 = vld [vmem:[#allocation7] sm:$0xff]  ;;  %v1032_v63 = vld [vmem:[#allocation7 + $0x8] sm:$0xff]  ;;  %v1034_v3 = vld [vmem:[#allocation7 + $0x18] sm:$0xff] }
  0x6c   : > { %1336 = vmatpush3.bf16.msra.mxu0 %v1335_v4  ;;  %s1614_s28 = smov 80   ;;  %s1615_s7 = smov 112   ;;  %v1338_v2 = vpack.c.bf16 %v1032_v63, %v1031_v62  ;;  %vm1029_vm3 = vcmask 195584   ;;  %vm1042_vm4 = vcmask 261120  }
  0x6d   : > { %1288 = vmatprep.subr.mxu0 %v1610_v1  ;;  %s1616_s6 = smov 72   ;;  %s1617_s30 = smov 104  }
  0x6e   : > { %s1618_s15 = smov 56   ;;  %s1619_s16 = smov 64  }
  0x6f   : > { %1281 = vmatmul.mubr.msk.f32.vlgmr.msra.gmra.mrb[0].mxu0 %vm279_vm1, %v269_v5  ;;  %s1620_s9 = smov 40   ;;  %s1621_s29 = smov 48  }
  0x70   : > { %1290 = vmatprep.mubr.msk.f32.mxu0 %vm1609_vm0, %v1610_v1  ;;  %s1622_s17 = smov 8   ;;  %s1623_s24 = smov 16  }
  0x71   : > { %s1624_s26 = smov 24   ;;  %p1979_p0 = scmp.ne.s32.totalorder %s1974_s23, 0 }
 0x142   : > { %v349_v7 = vpop.f32.mrb[0].mxu0 }
 0x143   : > { %v1852_v8 = vadd.f32 %v1232_v6, %v349_v7  ;;  %v1282_v9 = vpop.f32.mrb[1].mxu0 }
 0x145   : > { %355 = vrot.lane.b32.xlu0 %v1852_v8, %s1611_s8  ;;  %v353_v10 = vmul.f32 0.35355338, %v1852_v8 }
 0x147   : > { %520 = vrot.lane.b32.xlu1 %v353_v10, %s1612_s10 }
 0x149   : > { %522 = vrot.lane.b32.xlu0 %v1852_v8, %s1613_s11  ;;  %s1249_s11 = sshll.u32 %s1677_s22, 7  ;;  %s1625_s22 = smov [#allocation8]  }
 0x14b   : > { %687 = vrot.lane.b32.xlu1 %v1852_v8, %s1614_s28  ;;  %s268_s28 = scalar_lea.vmem [#allocation8], %s1228_s13  ;;  %s1535_s13 = sshll.u32 %s1625_s22, 4  ;;  %s1536_s13 = int_to_ptr.vmem [resolvable:$false] %s1535_s13 }
 0x14d   : > { %685 = vrot.lane.b32.xlu0 %v353_v10, %s1615_s7  ;;  %s1131_s7 = sshll.u32 %s268_s28, 4  ;;  %s1918_s7 = int_to_ptr.vmem [resolvable:$true] %s1131_s7 }
 0x14e   : > { %p1538_p7 = scmp.lt.s32.totalorder %s1918_s7, %s1536_s13 }
 0x14f   : > { %852 = vrot.lane.b32.xlu1 %v1852_v8, %s1616_s6 }
 0x151   : > { %850 = vrot.lane.b32.xlu0 %v353_v10, %s1617_s30 }
 0x1b7   : > { %v356_v11 = vpop.permute.xlu0 %355 }
 0x1b8   : > { %1284 = vmatpush3.xpose.msk.msra.mxu1 %vm357_vm2, %v356_v11 }
 0x1b9   : > { %v521_v12 = vpop.permute.xlu1 %520  ;;  %1293 = vmatprep.subr.mxu1 %v1610_v1 }
 0x1bb   : > { %v523_v13 = vpop.permute.xlu0 %522  ;;  %1286 = vmatmul.mubr.msk.f32.vlgmr.msra.gmra.mrb[0].mxu1 %vm357_vm2, %v353_v10 }
 0x1bc   : > { %1294 = vmatpush3.xpose.msk.msra.mxu1 %vm357_vm2, %v523_v13  ;;  %1295 = vmatprep.mubr.msk.f32.mxu1 %vm1609_vm0, %v1610_v1 }
 0x1bd   : > { %v688_v14 = vpop.permute.xlu1 %687  ;;  %1303 = vmatprep.subr.mxu1 %v1610_v1 }
 0x1bf   : > { %1296 = vmatmul.mubr.msk.f32.vlgmr.msra.gmra.mrb[2].mxu1 %vm357_vm2, %v521_v12  ;;  %v686_v15 = vpop.permute.xlu0 %685 }
 0x1c0   : > { %1304 = vmatpush3.xpose.msk.msra.mxu1 %vm357_vm2, %v688_v14  ;;  %1305 = vmatprep.mubr.msk.f32.mxu1 %vm1609_vm0, %v1610_v1 }
 0x1c1   : > { %1313 = vmatprep.subr.mxu1 %v1610_v1  ;;  %v853_v16 = vpop.permute.xlu1 %852 }
 0x1c3   : > { %1306 = vmatmul.mubr.msk.f32.vlgmr.msra.gmra.mrb[4].mxu1 %vm357_vm2, %v686_v15  ;;  %v851_v17 = vpop.permute.xlu0 %850 }
 0x1c4   : > { %1314 = vmatpush3.xpose.msk.msra.mxu1 %vm357_vm2, %v853_v16  ;;  %1315 = vmatprep.mubr.msk.f32.mxu1 %vm1609_vm0, %v1610_v1 }
 0x1c5   : > { %1337 = vmatprep.subr.bf16.mxu1 %v1608_v0 }
 0x1c7   : > { %1316 = vmatmul.mubr.msk.f32.vlgmr.msra.gmra.mrb[6].mxu1 %vm357_vm2, %v851_v17 }
 0x1c8   : > { %1331 = vmatprep.mubr.msk.f32.mxu1 %vm1609_vm0, %v1610_v1  ;;  %1339 = vmatpush3.bf16.msra.mxu1 %v1338_v2 }
 0x1c9   : > { %1340 = vmatprep.subr.bf16.mxu1 %v1608_v0 }
 0x28e   : > { %v429_v18 = vpop.f32.mrb[0].mxu1 }
 0x28f   : > { %v1287_v19 = vpop.f32.mrb[1].mxu1  ;;  %v433_v20 = vsel %vm357_vm2, %v429_v18, -inf }
 0x290   : > { %434 = vmax.xlane.f32.xlu1 %v433_v20 }
 0x292   : > { %v594_v21 = vpop.f32.mrb[2].mxu1 }
 0x293   : > { %v1297_v22 = vpop.f32.mrb[3].mxu1  ;;  %v598_v23 = vsel %vm357_vm2, %v594_v21, -inf }
 0x294   : > { %599 = vmax.xlane.f32.xlu0 %v598_v23  ;;  %v1246_v22 = vld [vmem:[%s1964_s4] ss:$0 sm:$0xff] }
 0x296   : > { %v759_v24 = vpop.f32.mrb[4].mxu1 }
 0x297   : > { %v1307_v25 = vpop.f32.mrb[5].mxu1  ;;  %v763_v26 = vsel %vm357_vm2, %v759_v24, -inf }
 0x298   : > { %764 = vmax.xlane.f32.xlu0 %v763_v26 }
 0x29a   : > { %v924_v27 = vpop.f32.mrb[6].mxu1 }
 0x29b   : > { %v1317_v28 = vpop.f32.mrb[7].mxu1  ;;  %v928_v29 = vsel %vm357_vm2, %v924_v27, -inf }
 0x2a1   : > { %608 = vrot.lane.b32.xlu1 %v1852_v8, %s1618_s15  ;;  %s1916_s15 = scalar_lea.hbm %s1965_s5, %s1249_s11 }
 0x2ae   : > { %443 = vrot.lane.b32.xlu0 %v1852_v8, %s1619_s16  ;;  %s1118_s16 = scalar_lea.sflag [#allocation4], %s1825_s12 }
 0x2b2   : > { %938 = vrot.lane.b32.xlu0 %v1852_v8, %s1620_s9  ;;  %s1531_s9 = scalar_lea.vmem %s1918_s7, 128 }
 0x2b3   : > { %p1532_p11 = scmp.ne.s32.totalorder %s1918_s7, %s1531_s9 }
 0x2b5   : > { %p1533_p1 = pnand %p1532_p11, %p1979_p0 }
 0x2b7   : > { %p1534_p3 = pneg %p1533_p1 }
 0x2c5   : > { %929 = vmax.xlane.f32.xlu1 %v928_v29 }
 0x2d6   : > { %773 = vrot.lane.b32.xlu1 %v1852_v8, %s1621_s29  ;;  %s1537_s29 = scalar_lea.vmem %s1536_s13, 256 }
 0x2d7   : > { %p1539_p9 = scmp.lt.s32.totalorder %s1537_s29, %s1531_s9 }
 0x2d9   : > { %p1540_p12 = por %p1539_p9, %p1538_p7 }
 0x2db   : > { %p1541_p2 = pnand %p1540_p12, %p1534_p3 }
 0x31d   : > { %v435_v30 = vpop.xlane.xlu1 %434 }
 0x31e   : > { %v436_v31 = vsub.f32 %v429_v18, %v435_v30 }
 0x320   : > { %v437_v32 = vmul.f32 1.442695, %v436_v31 }
 0x321   : > { %v600_v33 = vpop.xlane.xlu0 %599  ;;  %v609_v41 = vpop.permute.xlu1 %608 }
 0x322   : > { %1429 = vpow2.f32 %v437_v32  ;;  %v601_v34 = vsub.f32 %v594_v21, %v600_v33 }
 0x324   : > { %v602_v35 = vmul.f32 1.442695, %v601_v34 }
 0x325   : > { %v765_v36 = vpop.xlane.xlu0 %764 }
 0x326   : > { %1431 = vpow2.f32 %v602_v35  ;;  %v766_v37 = vsub.f32 %v759_v24, %v765_v36 }
 0x328   : > { %v767_v38 = vmul.f32 1.442695, %v766_v37 }
 0x329   : > { %v444_v39 = vpop.permute.xlu0 %443 }
 0x32a   : > { %1433 = vpow2.f32 %v767_v38  ;;  %1289 = vmatpush3.msra.mxu0 %v444_v39 }
 0x32b   : > { %1298 = vmatprep.subr.mxu0 %v1610_v1 }
 0x32c   : > { %v1430_v40 = vpop.eup %1429 }
 0x32d   : > { %1291 = vmatmul.mubr.msk.f32.vlgmr.msra.gmra.mrb[2].mxu0 %vm357_vm2, %v1430_v40  ;;  %v439_v46 = vsel %vm357_vm2, %v1430_v40, 0.0  ;;  %v939_v51 = vpop.permute.xlu0 %938 }
 0x32e   : > { %1299 = vmatpush3.msra.mxu0 %v609_v41  ;;  %1300 = vmatprep.mubr.msk.f32.mxu0 %vm1609_vm0, %v1610_v1 }
 0x32f   : > { %1308 = vmatprep.subr.mxu0 %v1610_v1 }
 0x330   : > { %v1432_v42 = vpop.eup %1431 }
 0x331   : > { %1301 = vmatmul.mubr.msk.f32.vlgmr.msra.gmra.mrb[4].mxu0 %vm357_vm2, %v1432_v42  ;;  %v604_v43 = vsel %vm357_vm2, %v1432_v42, 0.0 }
 0x332   : > { %605 = vadd.xlane.f32.xlu1 %v604_v43  ;;  %1310 = vmatprep.mubr.msk.f32.mxu0 %vm1609_vm0, %v1610_v1 }
 0x334   : > { %v1434_v44 = vpop.eup %1433 }
 0x335   : > { %v769_v45 = vsel %vm357_vm2, %v1434_v44, 0.0 }
 0x336   : > { %770 = vadd.xlane.f32.xlu0 %v769_v45  ;;  %440 = vadd.xlane.f32.xlu1 %v439_v46 }
 0x352   : > { %v930_v47 = vpop.xlane.xlu1 %929 }
 0x353   : > { %v931_v48 = vsub.f32 %v924_v27, %v930_v47 }
 0x355   : > { %v932_v49 = vmul.f32 1.442695, %v931_v48 }
 0x356   : > { %v774_v50 = vpop.permute.xlu1 %773 }
 0x357   : > { %1435 = vpow2.f32 %v932_v49  ;;  %1309 = vmatpush3.msra.mxu0 %v774_v50 }
 0x358   : > { %1311 = vmatmul.mubr.msk.f32.vlgmr.msra.gmra.mrb[6].mxu0 %vm357_vm2, %v1434_v44  ;;  %1318 = vmatprep.subr.mxu0 %v1610_v1 }
 0x359   : > { %1319 = vmatpush3.msra.mxu0 %v939_v51  ;;  %1320 = vmatprep.mubr.msk.f32.mxu0 %vm1609_vm0, %v1610_v1  ;;  %v1033_v1 = vld [vmem:[#allocation7 + $0x10] sm:$0xff] }
 0x35a   : > { %v1341_v4 = vpack.c.bf16 %v1034_v3, %v1033_v1 }
 0x35c   : > { %1342 = vmatpush3.bf16.msra.mxu1 %v1341_v4 }
 0x361   : > { %v1436_v52 = vpop.eup %1435 }
 0x362   : > { %1321 = vmatmul.mubr.msk.f32.vlgmr.msra.gmra.mrb[8].mxu0 %vm357_vm2, %v1436_v52  ;;  %v934_v53 = vsel %vm357_vm2, %v1436_v52, 0.0 }
 0x363   : > { %935 = vadd.xlane.f32.xlu0 %v934_v53 }
 0x3bf   : > { %v606_v54 = vpop.xlane.xlu1 %605 }
 0x3c0   : > { %1437 = vrcp.f32 %v606_v54 }
 0x3c3   : > { %v771_v61 = vpop.xlane.xlu0 %770  ;;  %v441_v14 = vpop.xlane.xlu1 %440 }
 0x3c4   : > { %1439 = vrcp.f32 %v771_v61 }
 0x3ca   : > { %v1438_v57 = vpop.eup %1437 }
 0x3ce   : > { %v1440_v6 = vpop.eup %1439 }
 0x3f0   : > { %v936_v5 = vpop.xlane.xlu0 %935 }
 0x3f1   : > { %1441 = vrcp.f32 %v936_v5 }
 0x3f2   : > { %1443 = vrcp.f32 %v441_v14 }
 0x3fb   : > { %v1442_v10 = vpop.eup %1441 }
 0x3fc   : > { %v1444_v0 = vpop.eup %1443 }
 0x400   : > { %v515_v55 = vpop.f32.mrb[2].mxu0 }
 0x401   : > { %v1292_v56 = vpop.f32.mrb[3].mxu0  ;;  %v519_v17 = vmul.f32 %v1444_v0, %v515_v55 }
 0x404   : > { %v680_v58 = vpop.f32.mrb[4].mxu0 }
 0x405   : > { %v684_v59 = vmul.f32 %v1438_v57, %v680_v58  ;;  %v1302_v60 = vpop.f32.mrb[5].mxu0 }
 0x407   : > { %1016 = vrot.lane.b32.xlu0 %v684_v59, %s1622_s17 }
 0x42b   : > { %v845_v7 = vpop.f32.mrb[6].mxu0 }
 0x42c   : > { %v849_v8 = vmul.f32 %v1440_v6, %v845_v7  ;;  %v1312_v9 = vpop.f32.mrb[7].mxu0 }
 0x42e   : > { %1020 = vrot.lane.b32.xlu1 %v849_v8, %s1623_s24 }
 0x435   : > { %v1010_v11 = vpop.f32.mrb[8].mxu0 }
 0x436   : > { %v1014_v12 = vmul.f32 %v1442_v10, %v1010_v11  ;;  %v1322_v13 = vpop.f32.mrb[9].mxu0 }
 0x438   : > { %1024 = vrot.lane.b32.xlu1 %v1014_v12, %s1624_s26 }
 0x479   : > { %v1017_v15 = vpop.permute.xlu0 %1016 }
 0x47a   : > { %v1027_v18 = vsel %vm357_vm2, %v519_v17, %v1017_v15 }
 0x4a0   : > { %v1021_v16 = vpop.permute.xlu1 %1020 }
 0x4a1   : > { %v1028_v19 = vsel %vm279_vm1, %v1027_v18, %v1021_v16 }
 0x4aa   : > { %v1025_v20 = vpop.permute.xlu1 %1024 }
 0x4ab   : > { %v1030_v21 = vsel %vm1029_vm3, %v1028_v19, %v1025_v20 }
 0x4ac   : > { %1332 = vmatmul.mubr.msk.f32.vlgmr.msra.gmra.mrb[8].mxu1 %vm1042_vm4, %v1030_v21 }
 0x57f   : > { %v1112_v23 = vpop.f32.mrb[8].mxu1 }
 0x580   : > { %v1113_v24 = vadd.f32 %v1246_v22, %v1112_v23  ;;  %v1333_v25 = vpop.f32.mrb[9].mxu1 }
 0x582   : > { %1116 = vst.msk [vmem:[%s268_s28] sm:$0xff] %vm1042_vm4, %v1113_v24 }
 0x583   : > { %1544 = shalt.err (!%p1541_p2)
}
 0x584   : > { %s1545_s12 = scalar_lea.hbm %s1916_s15, 128  ;;  %s1549_s26 = scalar_lea.hbm %s1965_s5, 256 }
 0x585   : > { %p1546_p13 = scmp.ne.s32.totalorder %s1916_s15, %s1545_s12  ;;  %p1550_p4 = scmp.lt.u32.totalorder %s1916_s15, %s1965_s5 }
 0x586   : > { %p1551_p5 = scmp.lt.u32.totalorder %s1549_s26, %s1545_s12  ;;  %p1553_p11 = scmp.lt.u32.totalorder %s1545_s12, %s1916_s15 }
 0x587   : > { %p1547_p6 = pnand %p1546_p13, %p1979_p0 }
 0x588   : > { %p1552_p8 = por %p1551_p5, %p1550_p4 }
 0x589   : > { %p1548_p10 = pneg %p1547_p6 }
 0x58a   : > { %p1554_p1 = por %p1553_p11, %p1552_p8 }
 0x58c   : > { %p1555_p3 = pnand %p1554_p1, %p1548_p10 }
 0x58e   : > { %1558 = shalt.err (!%p1555_p3)
}
 0x58f   : > { %1353 = dma.vmem_to_hbm [thread:$0]  (%p1979_p0), %s1918_s7, 128, %s1916_s15, %s1118_s16  }
 0x590 PF: > { %s1143_s11 = sand.u32 1, %s1589_s18   ;;  %p1980_p7 = scmp.ne.s32.totalorder %s1970_s25, 0 }
 0x591   : > { %p1981_p9 = scmp.ge.s32.totalorder %s1601_s21, 2  ;;  %s1144_s28 = scalar_lea.sflag [#allocation4], %s1143_s11 }
 0x593   : > { %p1367_p12 = pnand %p1981_p9, %p1980_p7 }
 0x595   : > { %1584 = dma.done.wait (!%p1367_p12), %s1144_s28, 128  }
 0x596   : > { %1586 = vsyncadd (!%p1367_p12), %s1144_s28, 4294967168  ;;  %p19_p2 = scmp.ge.s32.totalorder %s1766_s14, 4   ;;  %s1982_s18 = smov %s1593_s19 }
 0x597   : > { %s1983_s19 = smov %s1597_s20  ;;  %s1984_s20 = smov %s1782_s27 }
 0x598   : > { %s1985_s21 = smov %s1766_s14  ;;  %21 = sbr.rel (!%p19_p2) target bundleno = 6 (0x6), region = 93 }
 0x59f   :  { %1149 = vsyncpa [#allocation3], 1 }
 0x5a0   :  { %1151 = vsyncpa [#allocation3 + $0x1], 1 }
 0x5a1   :  { %1152 = vsyncpa [#allocation6], 1 }
 0x5a2   :  { %1153 = vsyncpa [#allocation4], 1 }
 0x5a3   :  { %1155 = vsyncpa [#allocation4 + $0x1], 1 }

</bundles_post_ra>
